<compile_context>
chip_gen: v5e
topology: v5e:2x2
jax: 0.10.0
libtpu: 0.0.40
codegen_flags: <defaults>
</compile_context>

<pallas_src>
import functools

import jax
import jax.numpy as jnp
from jax.experimental import pallas as pl
from jax.experimental.pallas import tpu as pltpu

BN_EPS = 1e-5
_LANE = 128
_STATS_ROWS = 8                        # sublane-aligned rows per per-tile stats block
_VMEM_LIMIT_BYTES = 48 * 1024 * 1024   # explicit scoped-VMEM budget (safe on v5e/v6e/v7x)


def _rup(x, m):
    return ((x + m - 1) // m) * m


def _choose_tile_m(m):
    """Token-tile size: large enough to amortize per-step overhead, 8-aligned."""
    if m <= 512:
        return _rup(m, 8)
    return 512


# ---------------------------------------------------------------------------
# Kernels (each runs on a 1-D grid over token tiles).
# Stats blocks are (8, C): row 0 = per-channel sum(y), row 1 = per-channel sum(y*y),
# rows 2..7 unused.
# ---------------------------------------------------------------------------

def _matmul_stats_kernel(x_ref, w_ref, y_ref, stats_ref, *, tile_m):
    """y = x @ W; emit per-tile channel sum / sum-of-squares (via ones-row matmul)."""
    y = jnp.dot(x_ref[...], w_ref[...], preferred_element_type=jnp.float32)
    y_ref[...] = y
    ones = jnp.ones((1, tile_m), jnp.float32)
    stats_ref[0:1, :] = jnp.dot(ones, y, preferred_element_type=jnp.float32)
    stats_ref[1:2, :] = jnp.dot(ones, y * y, preferred_element_type=jnp.float32)


def _bn_relu_matmul_stats_kernel(y_ref, scale_ref, shift_ref, w_ref,
                                 y2_ref, stats_ref, *, tile_m, m_true, mask_rows):
    """h = relu(y*scale+shift) (masked for padded rows); y2 = h @ W; emit stats."""
    h = jnp.maximum(y_ref[...] * scale_ref[...] + shift_ref[...], 0.0)
    if mask_rows:  # static: only traced when M was padded to a tile multiple
        row = (pl.program_id(0) * tile_m
               + jax.lax.broadcasted_iota(jnp.int32, (tile_m, 1), 0))
        h = jnp.where(row < m_true, h, 0.0)
    y2 = jnp.dot(h, w_ref[...], preferred_element_type=jnp.float32)
    y2_ref[...] = y2
    ones = jnp.ones((1, tile_m), jnp.float32)
    stats_ref[0:1, :] = jnp.dot(ones, y2, preferred_element_type=jnp.float32)
    stats_ref[1:2, :] = jnp.dot(ones, y2 * y2, preferred_element_type=jnp.float32)


def _bn_relu_matmul_bias_kernel(y_ref, scale_ref, shift_ref, w_ref, bias_ref, out_ref):
    """Final layer: h = relu(y*scale+shift); out = h @ W + bias (no BN/ReLU)."""
    h = jnp.maximum(y_ref[...] * scale_ref[...] + shift_ref[...], 0.0)
    out_ref[...] = (jnp.dot(h, w_ref[...], preferred_element_type=jnp.float32)
                    + bias_ref[...])


# ---------------------------------------------------------------------------
# Stage launchers (pallas_call wrappers).
# ---------------------------------------------------------------------------

def _compiler_params():
    return pltpu.CompilerParams(
        dimension_semantics=("parallel",),
        vmem_limit_bytes=_VMEM_LIMIT_BYTES,
    )


def _stage_matmul_stats(x, w, tile_m):
    m_pad, cin = x.shape
    cout = w.shape[1]
    t = m_pad // tile_m
    kernel = functools.partial(_matmul_stats_kernel, tile_m=tile_m)
    return pl.pallas_call(
        kernel,
        grid=(t,),
        in_specs=[
            pl.BlockSpec((tile_m, cin), lambda i: (i, 0)),
            pl.BlockSpec((cin, cout), lambda i: (0, 0)),
        ],
        out_specs=(
            pl.BlockSpec((tile_m, cout), lambda i: (i, 0)),
            pl.BlockSpec((_STATS_ROWS, cout), lambda i: (i, 0)),
        ),
        out_shape=(
            jax.ShapeDtypeStruct((m_pad, cout), jnp.float32),
            jax.ShapeDtypeStruct((_STATS_ROWS * t, cout), jnp.float32),
        ),
        compiler_params=_compiler_params(),
    )(x, w)


def _stage_bn_matmul_stats(y, scale, shift, w, tile_m, m_true):
    m_pad, cin = y.shape
    cout = w.shape[1]
    t = m_pad // tile_m
    kernel = functools.partial(
        _bn_relu_matmul_stats_kernel,
        tile_m=tile_m, m_true=m_true, mask_rows=(m_pad != m_true))
    return pl.pallas_call(
        kernel,
        grid=(t,),
        in_specs=[
            pl.BlockSpec((tile_m, cin), lambda i: (i, 0)),
            pl.BlockSpec((1, cin), lambda i: (0, 0)),
            pl.BlockSpec((1, cin), lambda i: (0, 0)),
            pl.BlockSpec((cin, cout), lambda i: (0, 0)),
        ],
        out_specs=(
            pl.BlockSpec((tile_m, cout), lambda i: (i, 0)),
            pl.BlockSpec((_STATS_ROWS, cout), lambda i: (i, 0)),
        ),
        out_shape=(
            jax.ShapeDtypeStruct((m_pad, cout), jnp.float32),
            jax.ShapeDtypeStruct((_STATS_ROWS * t, cout), jnp.float32),
        ),
        compiler_params=_compiler_params(),
    )(y, scale, shift, w)


def _stage_bn_matmul_bias(y, scale, shift, w, bias, tile_m):
    m_pad, cin = y.shape
    cout = w.shape[1]
    t = m_pad // tile_m
    return pl.pallas_call(
        _bn_relu_matmul_bias_kernel,
        grid=(t,),
        in_specs=[
            pl.BlockSpec((tile_m, cin), lambda i: (i, 0)),
            pl.BlockSpec((1, cin), lambda i: (0, 0)),
            pl.BlockSpec((1, cin), lambda i: (0, 0)),
            pl.BlockSpec((cin, cout), lambda i: (0, 0)),
            pl.BlockSpec((1, cout), lambda i: (0, 0)),
        ],
        out_specs=pl.BlockSpec((tile_m, cout), lambda i: (i, 0)),
        out_shape=jax.ShapeDtypeStruct((m_pad, cout), jnp.float32),
        compiler_params=_compiler_params(),
    )(y, scale, shift, w, bias)


def _bn_scale_shift(stats, gamma, beta, m_true):
    """Tiny JAX glue: reduce per-tile partial sums -> per-channel scale/shift."""
    cp = stats.shape[1]
    st = stats.reshape(-1, _STATS_ROWS, cp)
    s = jnp.sum(st[:, 0, :], axis=0)
    ss = jnp.sum(st[:, 1, :], axis=0)
    mean = s / m_true
    var = jnp.maximum(ss / m_true - mean * mean, 0.0)   # one-pass var, clamped
    scale = gamma.reshape(-1) * jax.lax.rsqrt(var + BN_EPS)
    shift = beta.reshape(-1) - mean * scale
    return scale.reshape(1, cp), shift.reshape(1, cp)


# ---------------------------------------------------------------------------
# Parameters.
# ---------------------------------------------------------------------------

def init_params(key, old_dim, new_dim, side_dim, inner_dim):
    """Deterministic parameter init with the same logical shapes as the PyTorch module.

    1x1 conv weights [Cout, Cin, 1, 1] are stored directly as [Cin, Cout] matmul
    matrices.  BatchNorm gamma/beta follow PyTorch init (ones/zeros).
    """
    def conv_w(k, cin, cout):
        return jax.random.normal(k, (cin, cout), jnp.float32) * (2.0 / cin) ** 0.5

    ks = jax.random.split(key, 8)
    p = {}
    # p1
    p["w1a"] = conv_w(ks[0], old_dim, 2 * old_dim)
    p["g1a"] = jnp.ones((1, 2 * old_dim), jnp.float32)
    p["b1a"] = jnp.zeros((1, 2 * old_dim), jnp.float32)
    p["w1b"] = conv_w(ks[1], 2 * old_dim, 2 * new_dim)
    p["g1b"] = jnp.ones((1, 2 * new_dim), jnp.float32)
    p["b1b"] = jnp.zeros((1, 2 * new_dim), jnp.float32)
    # p2
    p["w2a"] = conv_w(ks[2], side_dim, 2 * side_dim)
    p["g2a"] = jnp.ones((1, 2 * side_dim), jnp.float32)
    p["b2a"] = jnp.zeros((1, 2 * side_dim), jnp.float32)
    p["w2b"] = conv_w(ks[3], 2 * side_dim, 2 * new_dim)
    p["g2b"] = jnp.ones((1, 2 * new_dim), jnp.float32)
    p["b2b"] = jnp.zeros((1, 2 * new_dim), jnp.float32)
    # mixer
    p["wm1"] = conv_w(ks[4], 4 * new_dim, inner_dim)
    p["gm1"] = jnp.ones((1, inner_dim), jnp.float32)
    p["bm1"] = jnp.zeros((1, inner_dim), jnp.float32)
    p["wm2"] = conv_w(ks[5], inner_dim, inner_dim)
    p["gm2"] = jnp.ones((1, inner_dim), jnp.float32)
    p["bm2"] = jnp.zeros((1, inner_dim), jnp.float32)
    p["wm3"] = conv_w(ks[6], inner_dim, new_dim)
    p["bias3"] = jax.random.normal(ks[7], (1, new_dim), jnp.float32) * 0.01
    return p


def _pack_params(params, old_dim, new_dim, side_dim, inner_dim):
    """Block-diagonal fusion of p1/p2 + zero-padding of channel dims to 128 multiples."""
    c1 = 2 * (old_dim + side_dim)   # layer-A output channels: [2*old | 2*side]
    c2 = 4 * new_dim                # layer-B output channels: [2*new (p1) | 2*new (p2)]
    c3 = inner_dim
    c4 = new_dim
    c0 = old_dim + side_dim
    c1p, c2p, c3p, c4p = (_rup(c, _LANE) for c in (c1, c2, c3, c4))

    def pad_vec(v, cp):
        v = v.reshape(-1).astype(jnp.float32)
        return jnp.zeros((cp,), jnp.float32).at[: v.shape[0]].set(v)

    pk = {}
    # Layer A: block-diag(w1a, w2a): (old+side) -> (2*old | 2*side), padded to c1p.
    w_a = jnp.zeros((c0, c1p), jnp.float32)
    w_a = w_a.at[:old_dim, : 2 * old_dim].set(params["w1a"])
    w_a = w_a.at[old_dim:, 2 * old_dim:c1].set(params["w2a"])
    pk["wA"] = w_a
    pk["gA"] = pad_vec(jnp.concatenate(
        [params["g1a"].reshape(-1), params["g2a"].reshape(-1)]), c1p)
    pk["bA"] = pad_vec(jnp.concatenate(
        [params["b1a"].reshape(-1), params["b2a"].reshape(-1)]), c1p)

    # Layer B: block-diag(w1b, w2b): (2*old | 2*side) -> (2*new | 2*new), padded.
    w_b = jnp.zeros((c1p, c2p), jnp.float32)
    w_b = w_b.at[: 2 * old_dim, : 2 * new_dim].set(params["w1b"])
    w_b = w_b.at[2 * old_dim:c1, 2 * new_dim:c2].set(params["w2b"])
    pk["wB"] = w_b
    pk["gB"] = pad_vec(jnp.concatenate(
        [params["g1b"].reshape(-1), params["g2b"].reshape(-1)]), c2p)
    pk["bB"] = pad_vec(jnp.concatenate(
        [params["b1b"].reshape(-1), params["b2b"].reshape(-1)]), c2p)

    # Mixer.
    pk["wM1"] = jnp.zeros((c2p, c3p), jnp.float32).at[:c2, :c3].set(params["wm1"])
    pk["gM1"] = pad_vec(params["gm1"], c3p)
    pk["bM1"] = pad_vec(params["bm1"], c3p)
    pk["wM2"] = jnp.zeros((c3p, c3p), jnp.float32).at[:c3, :c3].set(params["wm2"])
    pk["gM2"] = pad_vec(params["gm2"], c3p)
    pk["bM2"] = pad_vec(params["bm2"], c3p)
    pk["wM3"] = jnp.zeros((c3p, c4p), jnp.float32).at[:c3, :c4].set(params["wm3"])
    pk["bias3"] = pad_vec(params["bias3"], c4p).reshape(1, c4p)
    return pk


# ---------------------------------------------------------------------------
# Forward pass.
# ---------------------------------------------------------------------------

@jax.jit
def mlp_bn_side_projection(old_feature, side_info, params):
    """old_feature: [N, old_dim, H, W]; side_info: [N, side_dim, H, W] (NCHW)."""
    n, old_dim, h, w = old_feature.shape
    _, side_dim, _, _ = side_info.shape
    inner_dim = params["wm1"].shape[1]
    new_dim = params["wm3"].shape[1]
    m = n * h * w

    pk = _pack_params(params, old_dim, new_dim, side_dim, inner_dim)

    # NCHW -> NHWC -> [M, C]; no dtype upcast here (kernel matmuls accumulate in f32).
    x1 = jnp.transpose(old_feature, (0, 2, 3, 1)).reshape(m, old_dim)
    x2 = jnp.transpose(side_info, (0, 2, 3, 1)).reshape(m, side_dim)
    x = jnp.concatenate([x1, x2], axis=1)        # [M, old+side]

    tile_m = _choose_tile_m(m)
    m_pad = _rup(m, tile_m)
    if m_pad != m:
        x = jnp.pad(x, ((0, m_pad - m), (0, 0)))  # zero rows: inert for stage-0 stats

    # Stage 0: fused p1/p2 first layer (matmul only, stats of pre-activation).
    y1, st1 = _stage_matmul_stats(x, pk["wA"], tile_m)
    sc1, sh1 = _bn_scale_shift(st1, pk["gA"], pk["bA"], m)
    # Stage 1: BN+ReLU of layer A, fused p1/p2 second layer.
    y2, st2 = _stage_bn_matmul_stats(y1, sc1, sh1, pk["wB"], tile_m, m)
    sc2, sh2 = _bn_scale_shift(st2, pk["gB"], pk["bB"], m)
    # Stage 2: BN+ReLU of layer B (== concat of p1/p2 outputs), mixer layer 1.
    y3, st3 = _stage_bn_matmul_stats(y2, sc2, sh2, pk["wM1"], tile_m, m)
    sc3, sh3 = _bn_scale_shift(st3, pk["gM1"], pk["bM1"], m)
    # Stage 3: mixer layer 2.
    y4, st4 = _stage_bn_matmul_stats(y3, sc3, sh3, pk["wM2"], tile_m, m)
    sc4, sh4 = _bn_scale_shift(st4, pk["gM2"], pk["bM2"], m)
    # Stage 4: final projection (bias, no BN/ReLU); lane-dense padded output.
    out_pad = _stage_bn_matmul_bias(y4, sc4, sh4, pk["wM3"], pk["bias3"], tile_m)

    out = out_pad[:m, :new_dim]
    return jnp.transpose(out.reshape(n, h, w, new_dim), (0, 3, 1, 2))


def _reference(old_feature, side_info, params):
    """Pure-JAX reference (same math as the PyTorch module in train mode)."""
    def cbr(x, w, g, b):
        y = x @ w
        mean = jnp.mean(y, axis=0, keepdims=True)
        var = jnp.mean((y - mean) ** 2, axis=0, keepdims=True)
        return jnp.maximum((y - mean) * jax.lax.rsqrt(var + BN_EPS) * g + b, 0.0)

    n, c1, h, w = old_feature.shape
    _, c2, _, _ = side_info.shape
    m = n * h * w
    x1 = jnp.transpose(old_feature, (0, 2, 3, 1)).reshape(m, c1).astype(jnp.float32)
    x2 = jnp.transpose(side_info, (0, 2, 3, 1)).reshape(m, c2).astype(jnp.float32)
    h1 = cbr(cbr(x1, params["w1a"], params["g1a"], params["b1a"]),
             params["w1b"], params["g1b"], params["b1b"])
    h2 = cbr(cbr(x2, params["w2a"], params["g2a"], params["b2a"]),
             params["w2b"], params["g2b"], params["b2b"])
    hh = jnp.concatenate([h1, h2], axis=1)
    hh = cbr(hh, params["wm1"], params["gm1"], params["bm1"])
    hh = cbr(hh, params["wm2"], params["gm2"], params["bm2"])
    out = hh @ params["wm3"] + params["bias3"]
    new_dim = params["wm3"].shape[1]
    return jnp.transpose(out.reshape(n, h, w, new_dim), (0, 3, 1, 2))


if __name__ == "__main__":
    # Small, forward-consistent shapes.
    N, H, W = 2, 8, 8
    OLD_DIM, NEW_DIM, SIDE_DIM, INNER_DIM = 8, 16, 4, 64

    key = jax.random.PRNGKey(0)
    k_x1, k_x2, k_p, k_x3, k_x4 = jax.random.split(key, 5)
    params = init_params(k_p, OLD_DIM, NEW_DIM, SIDE_DIM, INNER_DIM)

    # Test 1: single token tile (M = 128).
    old_feature = jax.random.normal(k_x1, (N, OLD_DIM, H, W), jnp.float32)
    side_info = jax.random.normal(k_x2, (N, SIDE_DIM, H, W), jnp.float32)
    out = jax.block_until_ready(mlp_bn_side_projection(old_feature, side_info, params))
    ref = jax.block_until_ready(_reference(old_feature, side_info, params))
    assert out.shape == (N, NEW_DIM, H, W), out.shape
    assert jnp.allclose(out, ref, atol=5e-4, rtol=5e-4), float(jnp.max(jnp.abs(out - ref)))

    # Test 2: multi-tile grid with a partial last tile (M = 768, tile 512, padded to 1024).
    N2, H2, W2 = 2, 16, 24
    old2 = jax.random.normal(k_x3, (N2, OLD_DIM, H2, W2), jnp.float32)
    side2 = jax.random.normal(k_x4, (N2, SIDE_DIM, H2, W2), jnp.float32)
    out2 = jax.block_until_ready(mlp_bn_side_projection(old2, side2, params))
    ref2 = jax.block_until_ready(_reference(old2, side2, params))
    assert out2.shape == (N2, NEW_DIM, H2, W2), out2.shape
    assert jnp.allclose(out2, ref2, atol=5e-4, rtol=5e-4), float(jnp.max(jnp.abs(out2 - ref2)))

    print("KERNEL_OK")
</pallas_src>

<mosaic_0001>
module attributes {stable_mosaic.version = 11 : i64} {
  func.func @_matmul_stats_kernel(%arg0: i32, %arg1: memref<128x12xf32, #tpu.memory_space<vmem>>, %arg2: memref<12x128xf32, #tpu.memory_space<vmem>>, %arg3: memref<128x128xf32, #tpu.memory_space<vmem>>, %arg4: memref<8x128xf32, #tpu.memory_space<vmem>>) attributes {dimension_semantics = [#tpu.dimension_semantics<parallel>], iteration_bounds = array<i64: 1>, scalar_prefetch = 0 : i64, scratch_operands = 0 : i64, tpu.core_type = #tpu.core_type<tc>, window_params = [{transform_indices = @transform_0, window_bounds = array<i64: 128, 12>}, {pipeline_mode = #tpu.pipeline_mode<synchronous>, transform_indices = @transform_1, window_bounds = array<i64: 12, 128>}, {transform_indices = @transform_2, window_bounds = array<i64: 128, 128>}, {transform_indices = @transform_3, window_bounds = array<i64: 8, 128>}]} {
    %c0 = arith.constant 0 : index
    %c0_0 = arith.constant 0 : index
    %0 = vector.load %arg1[%c0, %c0_0] : memref<128x12xf32, #tpu.memory_space<vmem>>, vector<128x12xf32>
    %c0_1 = arith.constant 0 : index
    %c0_2 = arith.constant 0 : index
    %1 = vector.load %arg2[%c0_1, %c0_2] : memref<12x128xf32, #tpu.memory_space<vmem>>, vector<12x128xf32>
    %cst = arith.constant dense<0.000000e+00> : vector<128x128xf32>
    %2 = tpu.matmul %0, %1, %cst {dimension_numbers = #tpu.dot_dimension_numbers<[1], [0], [0], [1], [0, 0, 1, 1], [], []>} : vector<128x12xf32>, vector<12x128xf32>, vector<128x128xf32> -> vector<128x128xf32>
    %c0_3 = arith.constant 0 : index
    %c0_4 = arith.constant 0 : index
    %3 = vector.load %arg3[%c0_3, %c0_4] : memref<128x128xf32, #tpu.memory_space<vmem>>, vector<128x128xf32>
    tpu.vector_store %arg3[%c0_3, %c0_4], %2 {strides = array<i32>} : memref<128x128xf32, #tpu.memory_space<vmem>>, vector<128x128xf32>,
    %cst_5 = arith.constant 1.000000e+00 : f32
    %4 = vector.broadcast %cst_5 : f32 to vector<1x128xf32>
    %cst_6 = arith.constant dense<0.000000e+00> : vector<1x128xf32>
    %5 = tpu.matmul %4, %2, %cst_6 {dimension_numbers = #tpu.dot_dimension_numbers<[1], [0], [0], [1], [0, 0, 1, 1], [], []>} : vector<1x128xf32>, vector<128x128xf32>, vector<1x128xf32> -> vector<1x128xf32>
    %c0_7 = arith.constant 0 : index
    %c0_8 = arith.constant 0 : index
    %6 = vector.load %arg4[%c0_7, %c0_8] : memref<8x128xf32, #tpu.memory_space<vmem>>, vector<1x128xf32>
    tpu.vector_store %arg4[%c0_7, %c0_8], %5 {strides = array<i32>} : memref<8x128xf32, #tpu.memory_space<vmem>>, vector<1x128xf32>,
    %7 = arith.mulf %2, %2 : vector<128x128xf32>
    %cst_9 = arith.constant dense<0.000000e+00> : vector<1x128xf32>
    %8 = tpu.matmul %4, %7, %cst_9 {dimension_numbers = #tpu.dot_dimension_numbers<[1], [0], [0], [1], [0, 0, 1, 1], [], []>} : vector<1x128xf32>, vector<128x128xf32>, vector<1x128xf32> -> vector<1x128xf32>
    %c1 = arith.constant 1 : index
    %c0_10 = arith.constant 0 : index
    %9 = vector.load %arg4[%c1, %c0_10] : memref<8x128xf32, #tpu.memory_space<vmem>>, vector<1x128xf32>
    tpu.vector_store %arg4[%c1, %c0_10], %8 {strides = array<i32>} : memref<8x128xf32, #tpu.memory_space<vmem>>, vector<1x128xf32>,
    return
  }
  func.func @transform_0(%arg0: i32) -> (i32, i32) {
    %c0_i32 = arith.constant 0 : i32
    %c0_i32_0 = arith.constant 0 : i32
    return %arg0, %c0_i32 : i32, i32
  }
  func.func @transform_1(%arg0: i32) -> (i32, i32) {
    %c0_i32 = arith.constant 0 : i32
    %c0_i32_0 = arith.constant 0 : i32
    %c0_i32_1 = arith.constant 0 : i32
    return %c0_i32, %c0_i32_0 : i32, i32
  }
  func.func @transform_2(%arg0: i32) -> (i32, i32) {
    %c0_i32 = arith.constant 0 : i32
    %c0_i32_0 = arith.constant 0 : i32
    return %arg0, %c0_i32 : i32, i32
  }
  func.func @transform_3(%arg0: i32) -> (i32, i32) {
    %c0_i32 = arith.constant 0 : i32
    %c0_i32_0 = arith.constant 0 : i32
    return %arg0, %c0_i32 : i32, i32
  }
}

module attributes {stable_mosaic.version = 11 : i64} {
  func.func @_bn_relu_matmul_stats_kernel(%arg0: i32, %arg1: memref<128x128xf32, #tpu.memory_space<vmem>>, %arg2: memref<1x128xf32, #tpu.memory_space<vmem>>, %arg3: memref<1x128xf32, #tpu.memory_space<vmem>>, %arg4: memref<128x128xf32, #tpu.memory_space<vmem>>, %arg5: memref<128x128xf32, #tpu.memory_space<vmem>>, %arg6: memref<8x128xf32, #tpu.memory_space<vmem>>) attributes {dimension_semantics = [#tpu.dimension_semantics<parallel>], iteration_bounds = array<i64: 1>, scalar_prefetch = 0 : i64, scratch_operands = 0 : i64, tpu.core_type = #tpu.core_type<tc>, window_params = [{transform_indices = @transform_0, window_bounds = array<i64: 128, 128>}, {pipeline_mode = #tpu.pipeline_mode<synchronous>, transform_indices = @transform_1, window_bounds = array<i64: 1, 128>}, {pipeline_mode = #tpu.pipeline_mode<synchronous>, transform_indices = @transform_2, window_bounds = array<i64: 1, 128>}, {pipeline_mode = #tpu.pipeline_mode<synchronous>, transform_indices = @transform_3, window_bounds = array<i64: 128, 128>}, {transform_indices = @transform_4, window_bounds = array<i64: 128, 128>}, {transform_indices = @transform_5, window_bounds = array<i64: 8, 128>}]} {
    %c0 = arith.constant 0 : index
    %c0_0 = arith.constant 0 : index
    %0 = vector.load %arg1[%c0, %c0_0] : memref<128x128xf32, #tpu.memory_space<vmem>>, vector<128x128xf32>
    %c0_1 = arith.constant 0 : index
    %c0_2 = arith.constant 0 : index
    %1 = vector.load %arg2[%c0_1, %c0_2] : memref<1x128xf32, #tpu.memory_space<vmem>>, vector<1x128xf32>
    %2 = vector.broadcast %1 : vector<1x128xf32> to vector<128x128xf32>
    %3 = arith.mulf %0, %2 : vector<128x128xf32>
    %c0_3 = arith.constant 0 : index
    %c0_4 = arith.constant 0 : index
    %4 = vector.load %arg3[%c0_3, %c0_4] : memref<1x128xf32, #tpu.memory_space<vmem>>, vector<1x128xf32>
    %5 = vector.broadcast %4 : vector<1x128xf32> to vector<128x128xf32>
    %6 = arith.addf %3, %5 : vector<128x128xf32>
    %cst = arith.constant 0.000000e+00 : f32
    %7 = vector.broadcast %cst : f32 to vector<128x128xf32>
    %8 = arith.maximumf %6, %7 : vector<128x128xf32>
    %c0_5 = arith.constant 0 : index
    %c0_6 = arith.constant 0 : index
    %9 = vector.load %arg4[%c0_5, %c0_6] : memref<128x128xf32, #tpu.memory_space<vmem>>, vector<128x128xf32>
    %cst_7 = arith.constant dense<0.000000e+00> : vector<128x128xf32>
    %10 = tpu.matmul %8, %9, %cst_7 {dimension_numbers = #tpu.dot_dimension_numbers<[1], [0], [0], [1], [0, 0, 1, 1], [], []>} : vector<128x128xf32>, vector<128x128xf32>, vector<128x128xf32> -> vector<128x128xf32>
    %c0_8 = arith.constant 0 : index
    %c0_9 = arith.constant 0 : index
    %11 = vector.load %arg5[%c0_8, %c0_9] : memref<128x128xf32, #tpu.memory_space<vmem>>, vector<128x128xf32>
    tpu.vector_store %arg5[%c0_8, %c0_9], %10 {strides = array<i32>} : memref<128x128xf32, #tpu.memory_space<vmem>>, vector<128x128xf32>,
    %cst_10 = arith.constant 1.000000e+00 : f32
    %12 = vector.broadcast %cst_10 : f32 to vector<1x128xf32>
    %cst_11 = arith.constant dense<0.000000e+00> : vector<1x128xf32>
    %13 = tpu.matmul %12, %10, %cst_11 {dimension_numbers = #tpu.dot_dimension_numbers<[1], [0], [0], [1], [0, 0, 1, 1], [], []>} : vector<1x128xf32>, vector<128x128xf32>, vector<1x128xf32> -> vector<1x128xf32>
    %c0_12 = arith.constant 0 : index
    %c0_13 = arith.constant 0 : index
    %14 = vector.load %arg6[%c0_12, %c0_13] : memref<8x128xf32, #tpu.memory_space<vmem>>, vector<1x128xf32>
    tpu.vector_store %arg6[%c0_12, %c0_13], %13 {strides = array<i32>} : memref<8x128xf32, #tpu.memory_space<vmem>>, vector<1x128xf32>,
    %15 = arith.mulf %10, %10 : vector<128x128xf32>
    %cst_14 = arith.constant dense<0.000000e+00> : vector<1x128xf32>
    %16 = tpu.matmul %12, %15, %cst_14 {dimension_numbers = #tpu.dot_dimension_numbers<[1], [0], [0], [1], [0, 0, 1, 1], [], []>} : vector<1x128xf32>, vector<128x128xf32>, vector<1x128xf32> -> vector<1x128xf32>
    %c1 = arith.constant 1 : index
    %c0_15 = arith.constant 0 : index
    %17 = vector.load %arg6[%c1, %c0_15] : memref<8x128xf32, #tpu.memory_space<vmem>>, vector<1x128xf32>
    tpu.vector_store %arg6[%c1, %c0_15], %16 {strides = array<i32>} : memref<8x128xf32, #tpu.memory_space<vmem>>, vector<1x128xf32>,
    return
  }
  func.func @transform_0(%arg0: i32) -> (i32, i32) {
    %c0_i32 = arith.constant 0 : i32
    %c0_i32_0 = arith.constant 0 : i32
    return %arg0, %c0_i32 : i32, i32
  }
  func.func @transform_1(%arg0: i32) -> (i32, i32) {
    %c0_i32 = arith.constant 0 : i32
    %c0_i32_0 = arith.constant 0 : i32
    %c0_i32_1 = arith.constant 0 : i32
    return %c0_i32, %c0_i32_0 : i32, i32
  }
  func.func @transform_2(%arg0: i32) -> (i32, i32) {
    %c0_i32 = arith.constant 0 : i32
    %c0_i32_0 = arith.constant 0 : i32
    %c0_i32_1 = arith.constant 0 : i32
    return %c0_i32, %c0_i32_0 : i32, i32
  }
  func.func @transform_3(%arg0: i32) -> (i32, i32) {
    %c0_i32 = arith.constant 0 : i32
    %c0_i32_0 = arith.constant 0 : i32
    %c0_i32_1 = arith.constant 0 : i32
    return %c0_i32, %c0_i32_0 : i32, i32
  }
  func.func @transform_4(%arg0: i32) -> (i32, i32) {
    %c0_i32 = arith.constant 0 : i32
    %c0_i32_0 = arith.constant 0 : i32
    return %arg0, %c0_i32 : i32, i32
  }
  func.func @transform_5(%arg0: i32) -> (i32, i32) {
    %c0_i32 = arith.constant 0 : i32
    %c0_i32_0 = arith.constant 0 : i32
    return %arg0, %c0_i32 : i32, i32
  }
}

module attributes {stable_mosaic.version = 11 : i64} {
  func.func @_bn_relu_matmul_bias_kernel(%arg0: i32, %arg1: memref<128x128xf32, #tpu.memory_space<vmem>>, %arg2: memref<1x128xf32, #tpu.memory_space<vmem>>, %arg3: memref<1x128xf32, #tpu.memory_space<vmem>>, %arg4: memref<128x128xf32, #tpu.memory_space<vmem>>, %arg5: memref<1x128xf32, #tpu.memory_space<vmem>>, %arg6: memref<128x128xf32, #tpu.memory_space<vmem>>) attributes {dimension_semantics = [#tpu.dimension_semantics<parallel>], iteration_bounds = array<i64: 1>, scalar_prefetch = 0 : i64, scratch_operands = 0 : i64, tpu.core_type = #tpu.core_type<tc>, window_params = [{transform_indices = @transform_0, window_bounds = array<i64: 128, 128>}, {pipeline_mode = #tpu.pipeline_mode<synchronous>, transform_indices = @transform_1, window_bounds = array<i64: 1, 128>}, {pipeline_mode = #tpu.pipeline_mode<synchronous>, transform_indices = @transform_2, window_bounds = array<i64: 1, 128>}, {pipeline_mode = #tpu.pipeline_mode<synchronous>, transform_indices = @transform_3, window_bounds = array<i64: 128, 128>}, {pipeline_mode = #tpu.pipeline_mode<synchronous>, transform_indices = @transform_4, window_bounds = array<i64: 1, 128>}, {transform_indices = @transform_5, window_bounds = array<i64: 128, 128>}]} {
    %c0 = arith.constant 0 : index
    %c0_0 = arith.constant 0 : index
    %0 = vector.load %arg1[%c0, %c0_0] : memref<128x128xf32, #tpu.memory_space<vmem>>, vector<128x128xf32>
    %c0_1 = arith.constant 0 : index
    %c0_2 = arith.constant 0 : index
    %1 = vector.load %arg2[%c0_1, %c0_2] : memref<1x128xf32, #tpu.memory_space<vmem>>, vector<1x128xf32>
    %2 = vector.broadcast %1 : vector<1x128xf32> to vector<128x128xf32>
    %3 = arith.mulf %0, %2 : vector<128x128xf32>
    %c0_3 = arith.constant 0 : index
    %c0_4 = arith.constant 0 : index
    %4 = vector.load %arg3[%c0_3, %c0_4] : memref<1x128xf32, #tpu.memory_space<vmem>>, vector<1x128xf32>
    %5 = vector.broadcast %4 : vector<1x128xf32> to vector<128x128xf32>
    %6 = arith.addf %3, %5 : vector<128x128xf32>
    %cst = arith.constant 0.000000e+00 : f32
    %7 = vector.broadcast %cst : f32 to vector<128x128xf32>
    %8 = arith.maximumf %6, %7 : vector<128x128xf32>
    %c0_5 = arith.constant 0 : index
    %c0_6 = arith.constant 0 : index
    %9 = vector.load %arg4[%c0_5, %c0_6] : memref<128x128xf32, #tpu.memory_space<vmem>>, vector<128x128xf32>
    %cst_7 = arith.constant dense<0.000000e+00> : vector<128x128xf32>
    %10 = tpu.matmul %8, %9, %cst_7 {dimension_numbers = #tpu.dot_dimension_numbers<[1], [0], [0], [1], [0, 0, 1, 1], [], []>} : vector<128x128xf32>, vector<128x128xf32>, vector<128x128xf32> -> vector<128x128xf32>
    %c0_8 = arith.constant 0 : index
    %c0_9 = arith.constant 0 : index
    %11 = vector.load %arg5[%c0_8, %c0_9] : memref<1x128xf32, #tpu.memory_space<vmem>>, vector<1x128xf32>
    %12 = vector.broadcast %11 : vector<1x128xf32> to vector<128x128xf32>
    %13 = arith.addf %10, %12 : vector<128x128xf32>
    %c0_10 = arith.constant 0 : index
    %c0_11 = arith.constant 0 : index
    %14 = vector.load %arg6[%c0_10, %c0_11] : memref<128x128xf32, #tpu.memory_space<vmem>>, vector<128x128xf32>
    tpu.vector_store %arg6[%c0_10, %c0_11], %13 {strides = array<i32>} : memref<128x128xf32, #tpu.memory_space<vmem>>, vector<128x128xf32>,
    return
  }
  func.func @transform_0(%arg0: i32) -> (i32, i32) {
    %c0_i32 = arith.constant 0 : i32
    %c0_i32_0 = arith.constant 0 : i32
    return %arg0, %c0_i32 : i32, i32
  }
  func.func @transform_1(%arg0: i32) -> (i32, i32) {
    %c0_i32 = arith.constant 0 : i32
    %c0_i32_0 = arith.constant 0 : i32
    %c0_i32_1 = arith.constant 0 : i32
    return %c0_i32, %c0_i32_0 : i32, i32
  }
  func.func @transform_2(%arg0: i32) -> (i32, i32) {
    %c0_i32 = arith.constant 0 : i32
    %c0_i32_0 = arith.constant 0 : i32
    %c0_i32_1 = arith.constant 0 : i32
    return %c0_i32, %c0_i32_0 : i32, i32
  }
  func.func @transform_3(%arg0: i32) -> (i32, i32) {
    %c0_i32 = arith.constant 0 : i32
    %c0_i32_0 = arith.constant 0 : i32
    %c0_i32_1 = arith.constant 0 : i32
    return %c0_i32, %c0_i32_0 : i32, i32
  }
  func.func @transform_4(%arg0: i32) -> (i32, i32) {
    %c0_i32 = arith.constant 0 : i32
    %c0_i32_0 = arith.constant 0 : i32
    %c0_i32_1 = arith.constant 0 : i32
    return %c0_i32, %c0_i32_0 : i32, i32
  }
  func.func @transform_5(%arg0: i32) -> (i32, i32) {
    %c0_i32 = arith.constant 0 : i32
    %c0_i32_0 = arith.constant 0 : i32
    return %arg0, %c0_i32 : i32, i32
  }
}

</mosaic_0001>

<bundles_post_ra>
// kernel: mlp_bn_side_projection.5
= control target key start
LH: loop header
LB: loop body
LE: loop exit
PB: predicated region body
PF: predicated region fallthrough
CT: control target
= control target key end

     0   :  { %vm80_vm0 = vcmask 1043456   ;;  %vm31_vm1 = vcmask 97280   ;;  %v251_v50 = vmov 1.0   ;;  %s408_s1 = inlined_call_operand.vmem [shape: f32[12,128], index: 1, kind: input, shape index: {}]   ;;  %s409_s0 = inlined_call_operand.vmem [shape: f32[128,12], index: 0, kind: input, shape index: {}]   ;;  %s410_s2 = inlined_call_operand.vmem [shape: f32[128,128], index: 2, kind: output, shape index: {0}]   ;;  %s411_s3 = inlined_call_operand.vmem [shape: f32[8,128], index: 3, kind: output, shape index: {1}]  }
   0x1   :  { %v30_v0 = vld [vmem:[%s408_s1 + $0x8] sm:$0xf]  ;;  %v29_v1 = vld [vmem:[%s408_s1] sm:$0xff]  ;;  %v20_v2 = vld [vmem:[%s409_s0 + $0x38] sm:$0xff] }
   0x2   :  { %248 = vmatpush.msk.msra.mxu3 %vm80_vm0, %v30_v0  ;;  %231 = vmatpush.msk.msra.mxu0 %vm80_vm0, %v30_v0  ;;  %v13_v3 = vld [vmem:[%s409_s0] sm:$0xff]  ;;  %v14_v5 = vld [vmem:[%s409_s0 + $0x8] sm:$0xff]  ;;  %v15_v7 = vld [vmem:[%s409_s0 + $0x10] sm:$0xff] }
   0x3   :  { %v21_v4 = vld [vmem:[%s409_s0 + $0x40] sm:$0xff]  ;;  %v22_v6 = vld [vmem:[%s409_s0 + $0x48] sm:$0xff]  ;;  %v23_v8 = vld [vmem:[%s409_s0 + $0x50] sm:$0xff] }
   0x4   :  { %249 = vmatpush.msra.mxu3 %v29_v1  ;;  %99 = vmatpush.msra.mxu0 %v29_v1  ;;  %v16_v9 = vld [vmem:[%s409_s0 + $0x18] sm:$0xff]  ;;  %v17_v11 = vld [vmem:[%s409_s0 + $0x20] sm:$0xff]  ;;  %v18_v13 = vld [vmem:[%s409_s0 + $0x28] sm:$0xff] }
   0x5   :  { %239 = vmatmul.msk.f32.vlgmr.msra.gmra.mxu3 %vm31_vm1, %v20_v2  ;;  %232 = vmatmul.msk.f32.vlgmr.msra.gmra.mxu0 %vm31_vm1, %v13_v3  ;;  %v24_v10 = vld [vmem:[%s409_s0 + $0x58] sm:$0xff]  ;;  %v25_v12 = vld [vmem:[%s409_s0 + $0x60] sm:$0xff]  ;;  %v26_v14 = vld [vmem:[%s409_s0 + $0x68] sm:$0xff] }
   0x6   :  { %v19_v15 = vld [vmem:[%s409_s0 + $0x30] sm:$0xff]  ;;  %v28_v17 = vld [vmem:[%s409_s0 + $0x78] sm:$0xff] }
   0x7   :  { %v27_v16 = vld [vmem:[%s409_s0 + $0x70] sm:$0xff] }
   0xd   :  { %240 = vmatmul.msk.f32.gmra.mxu3 %vm31_vm1, %v21_v4  ;;  %233 = vmatmul.msk.f32.gmra.mxu0 %vm31_vm1, %v14_v5 }
  0x15   :  { %241 = vmatmul.msk.f32.gmra.mxu3 %vm31_vm1, %v22_v6  ;;  %234 = vmatmul.msk.f32.gmra.mxu0 %vm31_vm1, %v15_v7 }
  0x1d   :  { %242 = vmatmul.msk.f32.gmra.mxu3 %vm31_vm1, %v23_v8  ;;  %235 = vmatmul.msk.f32.gmra.mxu0 %vm31_vm1, %v16_v9 }
  0x25   :  { %243 = vmatmul.msk.f32.gmra.mxu3 %vm31_vm1, %v24_v10  ;;  %236 = vmatmul.msk.f32.gmra.mxu0 %vm31_vm1, %v17_v11 }
  0x2d   :  { %244 = vmatmul.msk.f32.gmra.mxu3 %vm31_vm1, %v25_v12  ;;  %237 = vmatmul.msk.f32.gmra.mxu0 %vm31_vm1, %v18_v13 }
  0x35   :  { %245 = vmatmul.msk.f32.gmra.mxu3 %vm31_vm1, %v26_v14  ;;  %238 = vmatmul.msk.f32.gmra.mxu0 %vm31_vm1, %v19_v15 }
  0x3d   :  { %246 = vmatmul.msk.f32.gmra.mxu3 %vm31_vm1, %v27_v16 }
  0x45   :  { %247 = vmatmul.msk.f32.gmra.mxu3 %vm31_vm1, %v28_v17 }
  0x82   :  { %v345_v19 = vpop.f32.mrf.mxu0 }
  0x83   :  { %149 = vst [vmem:[%s410_s2] sm:$0xff] %v345_v19  ;;  %v186_v49 = vmul.f32 %v345_v19, %v345_v19 }
  0x88   :  { %v122_v18 = vpop.f32.mrf.mxu3 }
  0x89   :  { %156 = vst [vmem:[%s410_s2 + $0x38] sm:$0xff] %v122_v18  ;;  %v193_v42 = vmul.f32 %v122_v18, %v122_v18 }
  0x8a   :  { %v354_v21 = vpop.f32.mrf.mxu0 }
  0x8b   :  { %150 = vst [vmem:[%s410_s2 + $0x8] sm:$0xff] %v354_v21  ;;  %v187_v48 = vmul.f32 %v354_v21, %v354_v21 }
  0x90   :  { %v125_v20 = vpop.f32.mrf.mxu3 }
  0x91   :  { %157 = vst [vmem:[%s410_s2 + $0x40] sm:$0xff] %v125_v20  ;;  %v194_v41 = vmul.f32 %v125_v20, %v125_v20 }
  0x92   :  { %v107_v23 = vpop.f32.mrf.mxu0 }
  0x93   :  { %151 = vst [vmem:[%s410_s2 + $0x10] sm:$0xff] %v107_v23  ;;  %v188_v47 = vmul.f32 %v107_v23, %v107_v23 }
  0x98   :  { %v128_v22 = vpop.f32.mrf.mxu3 }
  0x99   :  { %158 = vst [vmem:[%s410_s2 + $0x48] sm:$0xff] %v128_v22  ;;  %v195_v40 = vmul.f32 %v128_v22, %v128_v22 }
  0x9a   :  { %v110_v25 = vpop.f32.mrf.mxu0 }
  0x9b   :  { %152 = vst [vmem:[%s410_s2 + $0x18] sm:$0xff] %v110_v25  ;;  %v189_v46 = vmul.f32 %v110_v25, %v110_v25 }
  0xa0   :  { %v131_v24 = vpop.f32.mrf.mxu3 }
  0xa1   :  { %159 = vst [vmem:[%s410_s2 + $0x50] sm:$0xff] %v131_v24  ;;  %v196_v39 = vmul.f32 %v131_v24, %v131_v24 }
  0xa2   :  { %v113_v27 = vpop.f32.mrf.mxu0 }
  0xa3   :  { %153 = vst [vmem:[%s410_s2 + $0x20] sm:$0xff] %v113_v27  ;;  %v190_v45 = vmul.f32 %v113_v27, %v113_v27 }
  0xa8   :  { %v134_v26 = vpop.f32.mrf.mxu3 }
  0xa9   :  { %160 = vst [vmem:[%s410_s2 + $0x58] sm:$0xff] %v134_v26  ;;  %v197_v38 = vmul.f32 %v134_v26, %v134_v26 }
  0xaa   :  { %v116_v29 = vpop.f32.mrf.mxu0 }
  0xab   :  { %154 = vst [vmem:[%s410_s2 + $0x28] sm:$0xff] %v116_v29  ;;  %v191_v44 = vmul.f32 %v116_v29, %v116_v29 }
  0xb0   :  { %v137_v28 = vpop.f32.mrf.mxu3 }
  0xb1   :  { %161 = vst [vmem:[%s410_s2 + $0x60] sm:$0xff] %v137_v28  ;;  %v198_v37 = vmul.f32 %v137_v28, %v137_v28 }
  0xb2   :  { %v119_v31 = vpop.f32.mrf.mxu0 }
  0xb3   :  { %155 = vst [vmem:[%s410_s2 + $0x30] sm:$0xff] %v119_v31  ;;  %v192_v43 = vmul.f32 %v119_v31, %v119_v31 }
  0xb8   :  { %v140_v30 = vpop.f32.mrf.mxu3 }
  0xb9   :  { %162 = vst [vmem:[%s410_s2 + $0x68] sm:$0xff] %v140_v30  ;;  %v199_v36 = vmul.f32 %v140_v30, %v140_v30 }
  0xc0   :  { %v143_v32 = vpop.f32.mrf.mxu3 }
  0xc1   :  { %163 = vst [vmem:[%s410_s2 + $0x70] sm:$0xff] %v143_v32  ;;  %v200_v35 = vmul.f32 %v143_v32, %v143_v32 }
  0xc8   :  { %v146_v33 = vpop.f32.mrf.mxu3 }
  0xc9   :  { %164 = vst [vmem:[%s410_s2 + $0x78] sm:$0xff] %v146_v33  ;;  %165 = vmatpush.msra.mxu1 %v146_v33  ;;  %v201_v34 = vmul.f32 %v146_v33, %v146_v33 }
  0xcb   :  { %166 = vmatpush.msra.mxu1 %v143_v32  ;;  %202 = vmatpush.msra.mxu2 %v201_v34 }
  0xcd   :  { %167 = vmatpush.msra.mxu1 %v140_v30  ;;  %203 = vmatpush.msra.mxu2 %v200_v35 }
  0xcf   :  { %168 = vmatpush.msra.mxu1 %v137_v28  ;;  %204 = vmatpush.msra.mxu2 %v199_v36 }
  0xd1   :  { %169 = vmatpush.msra.mxu1 %v134_v26  ;;  %205 = vmatpush.msra.mxu2 %v198_v37 }
  0xd3   :  { %170 = vmatpush.msra.mxu1 %v131_v24  ;;  %206 = vmatpush.msra.mxu2 %v197_v38 }
  0xd5   :  { %171 = vmatpush.msra.mxu1 %v128_v22  ;;  %207 = vmatpush.msra.mxu2 %v196_v39 }
  0xd7   :  { %172 = vmatpush.msra.mxu1 %v125_v20  ;;  %208 = vmatpush.msra.mxu2 %v195_v40 }
  0xd9   :  { %173 = vmatpush.msra.mxu1 %v122_v18  ;;  %209 = vmatpush.msra.mxu2 %v194_v41 }
  0xdb   :  { %174 = vmatpush.msra.mxu1 %v119_v31  ;;  %210 = vmatpush.msra.mxu2 %v193_v42 }
  0xdd   :  { %175 = vmatpush.msra.mxu1 %v116_v29  ;;  %211 = vmatpush.msra.mxu2 %v192_v43 }
  0xdf   :  { %176 = vmatpush.msra.mxu1 %v113_v27  ;;  %212 = vmatpush.msra.mxu2 %v191_v44 }
  0xe1   :  { %177 = vmatpush.msra.mxu1 %v110_v25  ;;  %213 = vmatpush.msra.mxu2 %v190_v45 }
  0xe3   :  { %178 = vmatpush.msra.mxu1 %v107_v23  ;;  %214 = vmatpush.msra.mxu2 %v189_v46 }
  0xe5   :  { %179 = vmatpush.msra.mxu1 %v354_v21  ;;  %215 = vmatpush.msra.mxu2 %v188_v47 }
  0xe7   :  { %180 = vmatpush.msra.mxu1 %v345_v19  ;;  %216 = vmatpush.msra.mxu2 %v187_v48 }
  0xe8   :  { %181 = vmatmul.f32.vlgmr.msra.gmra.mxu1 %v251_v50 }
  0xe9   :  { %217 = vmatpush.msra.mxu2 %v186_v49 }
  0xea   :  { %218 = vmatmul.f32.vlgmr.msra.gmra.mxu2 %v251_v50 }
 0x165   :  { %v182_v51 = vpop.f32.mrf.mxu1 }
 0x166   :  { %185 = vst [vmem:[%s411_s3] sm:$0x1] %v182_v51 }
 0x16d   :  { %v219_v52 = vpop.f32.mrf.mxu2 }
 0x16e   :  { %222 = vst [vmem:[%s411_s3 + $0x1] sm:$0x1] %v219_v52 }

// kernel: mlp_bn_side_projection.6
= control target key start
LH: loop header
LB: loop body
LE: loop exit
PB: predicated region body
PF: predicated region fallthrough
CT: control target
= control target key end

     0   :  { %s540_s3 = inlined_call_operand.vmem [shape: f32[128,128], index: 3, kind: input, shape index: {}]   ;;  %s541_s1 = inlined_call_operand.vmem [shape: f32[1,128], index: 1, kind: input, shape index: {}]   ;;  %s542_s2 = inlined_call_operand.vmem [shape: f32[1,128], index: 2, kind: input, shape index: {}]   ;;  %s543_s0 = inlined_call_operand.vmem [shape: f32[128,128], index: 0, kind: input, shape index: {}]   ;;  %s544_s4 = inlined_call_operand.vmem [shape: f32[128,128], index: 4, kind: output, shape index: {0}]   ;;  %s545_s5 = inlined_call_operand.vmem [shape: f32[8,128], index: 5, kind: output, shape index: {1}]  }
   0x1   :  { %v106_v0 = vld [vmem:[%s540_s3 + $0x78] sm:$0xff]  ;;  %v105_v1 = vld [vmem:[%s540_s3 + $0x70] sm:$0xff]  ;;  %v104_v2 = vld [vmem:[%s540_s3 + $0x68] sm:$0xff] }
   0x2   :  { %256 = vmatpush.msra.mxu3 %v106_v0  ;;  %107 = vmatpush.msra.mxu0 %v106_v0  ;;  %v103_v3 = vld [vmem:[%s540_s3 + $0x60] sm:$0xff]  ;;  %v102_v4 = vld [vmem:[%s540_s3 + $0x58] sm:$0xff]  ;;  %v101_v5 = vld [vmem:[%s540_s3 + $0x50] sm:$0xff] }
   0x3   :  { %254 = vmatpush.msra.mxu1 %v106_v0  ;;  %255 = vmatpush.msra.mxu2 %v106_v0  ;;  %v100_v6 = vld [vmem:[%s540_s3 + $0x48] sm:$0xff]  ;;  %v99_v7 = vld [vmem:[%s540_s3 + $0x40] sm:$0xff]  ;;  %v98_v8 = vld [vmem:[%s540_s3 + $0x38] sm:$0xff] }
   0x4   :  { %259 = vmatpush.msra.mxu3 %v105_v1  ;;  %108 = vmatpush.msra.mxu0 %v105_v1  ;;  %v97_v9 = vld [vmem:[%s540_s3 + $0x30] sm:$0xff]  ;;  %v369_v10 = vld [vmem:[%s541_s1] ss:$0 sm:$0xff]  ;;  %v30_v11 = vld [vmem:[%s543_s0 + $0x58] sm:$0xff] }
   0x5   :  { %257 = vmatpush.msra.mxu1 %v105_v1  ;;  %258 = vmatpush.msra.mxu2 %v105_v1  ;;  %v96_v12 = vld [vmem:[%s540_s3 + $0x28] sm:$0xff]  ;;  %v95_v13 = vld [vmem:[%s540_s3 + $0x20] sm:$0xff]  ;;  %v50_v14 = vmul.f32 %v369_v10, %v30_v11  ;;  %v94_v18 = vld [vmem:[%s540_s3 + $0x18] sm:$0xff] }
   0x6   :  { %262 = vmatpush.msra.mxu3 %v104_v2  ;;  %109 = vmatpush.msra.mxu0 %v104_v2  ;;  %v384_v15 = vld [vmem:[%s542_s2] ss:$0 sm:$0xff]  ;;  %v24_v17 = vld [vmem:[%s543_s0 + $0x28] sm:$0xff]  ;;  %v93_v21 = vld [vmem:[%s540_s3 + $0x10] sm:$0xff] }
   0x7   :  { %260 = vmatpush.msra.mxu1 %v104_v2  ;;  %261 = vmatpush.msra.mxu2 %v104_v2  ;;  %v19_v16 = vld [vmem:[%s543_s0] sm:$0xff]  ;;  %v44_v20 = vmul.f32 %v369_v10, %v24_v17  ;;  %v70_v22 = vadd.f32 %v384_v15, %v50_v14  ;;  %v92_v26 = vld [vmem:[%s540_s3 + $0x8] sm:$0xff]  ;;  %v25_v35 = vld [vmem:[%s543_s0 + $0x30] sm:$0xff] }
   0x8   :  { %265 = vmatpush.msra.mxu3 %v103_v3  ;;  %110 = vmatpush.msra.mxu0 %v103_v3  ;;  %v39_v19 = vmul.f32 %v369_v10, %v19_v16  ;;  %v31_v23 = vld [vmem:[%s543_s0 + $0x60] sm:$0xff]  ;;  %v28_v27 = vld [vmem:[%s543_s0 + $0x48] sm:$0xff]  ;;  %v45_v38 = vmul.f32 %v369_v10, %v25_v35  ;;  %v29_v41 = vld [vmem:[%s543_s0 + $0x50] sm:$0xff] }
   0x9   :  { %263 = vmatpush.msra.mxu1 %v103_v3  ;;  %264 = vmatpush.msra.mxu2 %v103_v3  ;;  %v64_v25 = vadd.f32 %v384_v15, %v44_v20  ;;  %v91_v28 = vld [vmem:[%s540_s3] sm:$0xff]  ;;  %v86_v29 = vmax.f32 %v70_v22, 0.0  ;;  %v51_v30 = vmul.f32 %v369_v10, %v31_v23  ;;  %v48_v31 = vmul.f32 %v369_v10, %v28_v27  ;;  %v20_v34 = vld [vmem:[%s543_s0 + $0x8] sm:$0xff]  ;;  %v21_v46 = vld [vmem:[%s543_s0 + $0x10] sm:$0xff] }
   0xa   :  { %268 = vmatpush.msra.mxu3 %v102_v4  ;;  %111 = vmatpush.msra.mxu0 %v102_v4  ;;  %v59_v24 = vadd.f32 %v384_v15, %v39_v19  ;;  %v40_v37 = vmul.f32 %v369_v10, %v20_v34  ;;  %v32_v42 = vld [vmem:[%s543_s0 + $0x68] sm:$0xff]  ;;  %v65_v44 = vadd.f32 %v384_v15, %v45_v38  ;;  %v26_v47 = vld [vmem:[%s543_s0 + $0x38] sm:$0xff]  ;;  %v33_v57 = vld [vmem:[%s543_s0 + $0x70] sm:$0xff] }
   0xb   :  { %266 = vmatpush.msra.mxu1 %v102_v4  ;;  %267 = vmatpush.msra.mxu2 %v102_v4  ;;  %v80_v33 = vmax.f32 %v64_v25, 0.0  ;;  %v68_v36 = vadd.f32 %v384_v15, %v48_v31  ;;  %v71_v39 = vadd.f32 %v384_v15, %v51_v30  ;;  %v49_v45 = vmul.f32 %v369_v10, %v29_v41  ;;  %v22_v60 = vld [vmem:[%s543_s0 + $0x18] sm:$0xff]  ;;  %v27_v61 = vld [vmem:[%s543_s0 + $0x40] sm:$0xff] }
   0xc   :  { %271 = vmatpush.msra.mxu3 %v101_v5  ;;  %112 = vmatpush.msra.mxu0 %v101_v5  ;;  %v75_v32 = vmax.f32 %v59_v24, 0.0  ;;  %v60_v43 = vadd.f32 %v384_v15, %v40_v37  ;;  %v52_v50 = vmul.f32 %v369_v10, %v32_v42  ;;  %v81_v52 = vmax.f32 %v65_v44, 0.0 }
   0xd   :  { %269 = vmatpush.msra.mxu1 %v101_v5  ;;  %270 = vmatpush.msra.mxu2 %v101_v5  ;;  %v84_v40 = vmax.f32 %v68_v36, 0.0  ;;  %v69_v48 = vadd.f32 %v384_v15, %v49_v45  ;;  %v87_v49 = vmax.f32 %v71_v39, 0.0  ;;  %v41_v53 = vmul.f32 %v369_v10, %v21_v46  ;;  %v34_v5 = vld [vmem:[%s543_s0 + $0x78] sm:$0xff] }
   0xe   :  { %274 = vmatpush.msra.mxu3 %v100_v6  ;;  %113 = vmatpush.msra.mxu0 %v100_v6  ;;  %v76_v51 = vmax.f32 %v60_v43, 0.0  ;;  %v46_v54 = vmul.f32 %v369_v10, %v26_v47  ;;  %v72_v56 = vadd.f32 %v384_v15, %v52_v50  ;;  %v53_v63 = vmul.f32 %v369_v10, %v33_v57 }
   0xf   :  { %272 = vmatpush.msra.mxu1 %v100_v6  ;;  %273 = vmatpush.msra.mxu2 %v100_v6  ;;  %v85_v55 = vmax.f32 %v69_v48, 0.0  ;;  %v61_v58 = vadd.f32 %v384_v15, %v41_v53  ;;  %v42_v2 = vmul.f32 %v369_v10, %v22_v60  ;;  %v47_v3 = vmul.f32 %v369_v10, %v27_v61 }
  0x10   :  { %277 = vmatpush.msra.mxu3 %v99_v7  ;;  %114 = vmatpush.msra.mxu0 %v99_v7  ;;  %v66_v59 = vadd.f32 %v384_v15, %v46_v54  ;;  %v88_v62 = vmax.f32 %v72_v56, 0.0  ;;  %v73_v4 = vadd.f32 %v384_v15, %v53_v63  ;;  %v54_v11 = vmul.f32 %v369_v10, %v34_v5 }
  0x11   :  { %275 = vmatpush.msra.mxu1 %v99_v7  ;;  %276 = vmatpush.msra.mxu2 %v99_v7  ;;  %v77_v0 = vmax.f32 %v61_v58, 0.0  ;;  %v62_v6 = vadd.f32 %v384_v15, %v42_v2  ;;  %v67_v7 = vadd.f32 %v384_v15, %v47_v3  ;;  %v305_v50 = vmov 1.0  }
  0x12   :  { %280 = vmatpush.msra.mxu3 %v98_v8  ;;  %115 = vmatpush.msra.mxu0 %v98_v8  ;;  %v82_v1 = vmax.f32 %v66_v59, 0.0  ;;  %v74_v16 = vadd.f32 %v384_v15, %v54_v11 }
  0x13   :  { %278 = vmatpush.msra.mxu1 %v98_v8  ;;  %279 = vmatpush.msra.mxu2 %v98_v8  ;;  %v23_v8 = vld [vmem:[%s543_s0 + $0x20] sm:$0xff] }
  0x14   :  { %283 = vmatpush.msra.mxu3 %v97_v9  ;;  %116 = vmatpush.msra.mxu0 %v97_v9  ;;  %v43_v14 = vmul.f32 %v369_v10, %v23_v8 }
  0x15   :  { %281 = vmatpush.msra.mxu1 %v97_v9  ;;  %282 = vmatpush.msra.mxu2 %v97_v9  ;;  %v89_v9 = vmax.f32 %v73_v4, 0.0 }
  0x16   :  { %286 = vmatpush.msra.mxu3 %v96_v12  ;;  %117 = vmatpush.msra.mxu0 %v96_v12  ;;  %v63_v17 = vadd.f32 %v384_v15, %v43_v14 }
  0x17   :  { %284 = vmatpush.msra.mxu1 %v96_v12  ;;  %285 = vmatpush.msra.mxu2 %v96_v12  ;;  %v78_v12 = vmax.f32 %v62_v6, 0.0 }
  0x18   :  { %289 = vmatpush.msra.mxu3 %v95_v13  ;;  %118 = vmatpush.msra.mxu0 %v95_v13  ;;  %v79_v19 = vmax.f32 %v63_v17, 0.0 }
  0x19   :  { %287 = vmatpush.msra.mxu1 %v95_v13  ;;  %288 = vmatpush.msra.mxu2 %v95_v13  ;;  %v83_v13 = vmax.f32 %v67_v7, 0.0 }
  0x1a   :  { %292 = vmatpush.msra.mxu3 %v94_v18  ;;  %119 = vmatpush.msra.mxu0 %v94_v18 }
  0x1b   :  { %290 = vmatpush.msra.mxu1 %v94_v18  ;;  %291 = vmatpush.msra.mxu2 %v94_v18  ;;  %v90_v18 = vmax.f32 %v74_v16, 0.0 }
  0x1c   :  { %295 = vmatpush.msra.mxu3 %v93_v21  ;;  %120 = vmatpush.msra.mxu0 %v93_v21 }
  0x1d   :  { %293 = vmatpush.msra.mxu1 %v93_v21  ;;  %294 = vmatpush.msra.mxu2 %v93_v21 }
  0x1e   :  { %298 = vmatpush.msra.mxu3 %v92_v26  ;;  %121 = vmatpush.msra.mxu0 %v92_v26 }
  0x1f   :  { %296 = vmatpush.msra.mxu1 %v92_v26  ;;  %297 = vmatpush.msra.mxu2 %v92_v26 }
  0x20   :  { %301 = vmatpush.msra.mxu3 %v91_v28  ;;  %122 = vmatpush.msra.mxu0 %v91_v28 }
  0x21   :  { %156 = vmatmul.f32.vlgmr.msra.gmra.mxu3 %v86_v29  ;;  %299 = vmatpush.msra.mxu1 %v91_v28 }
  0x22   :  { %123 = vmatmul.f32.vlgmr.msra.gmra.mxu0 %v75_v32  ;;  %138 = vmatmul.f32.vlgmr.msra.gmra.mxu1 %v80_v33 }
  0x23   :  { %300 = vmatpush.msra.mxu2 %v91_v28 }
  0x24   :  { %150 = vmatmul.f32.vlgmr.msra.gmra.mxu2 %v84_v40 }
  0x29   :  { %159 = vmatmul.f32.gmra.mxu3 %v87_v49 }
  0x2a   :  { %126 = vmatmul.f32.gmra.mxu0 %v76_v51  ;;  %141 = vmatmul.f32.gmra.mxu1 %v81_v52 }
  0x2c   :  { %153 = vmatmul.f32.gmra.mxu2 %v85_v55 }
  0x31   :  { %162 = vmatmul.f32.gmra.mxu3 %v88_v62 }
  0x32   :  { %129 = vmatmul.f32.gmra.mxu0 %v77_v0  ;;  %144 = vmatmul.f32.gmra.mxu1 %v82_v1 }
  0x39   :  { %165 = vmatmul.f32.gmra.mxu3 %v89_v9 }
  0x3a   :  { %132 = vmatmul.f32.gmra.mxu0 %v78_v12  ;;  %147 = vmatmul.f32.gmra.mxu1 %v83_v13 }
  0x41   :  { %168 = vmatmul.f32.gmra.mxu3 %v90_v18 }
  0x42   :  { %135 = vmatmul.f32.gmra.mxu0 %v79_v19 }
  0x9f   :  { %v474_v20 = vpop.f32.mrf.mxu0  ;;  %v139_v21 = vpop.f32.mrf.mxu1 }
  0xa0   :  { %172 = vst [vmem:[%s544_s4] sm:$0xff] %v474_v20  ;;  %v214_v44 = vmul.f32 %v139_v21, %v139_v21  ;;  %v209_v49 = vmul.f32 %v474_v20, %v474_v20 }
  0xa1   :  { %177 = vst [vmem:[%s544_s4 + $0x28] sm:$0xff] %v139_v21 }
  0xa4   :  { %v157_v10 = vpop.f32.mrf.mxu3 }
  0xa5   :  { %183 = vst [vmem:[%s544_s4 + $0x58] sm:$0xff] %v157_v10  ;;  %v220_v38 = vmul.f32 %v157_v10, %v157_v10 }
  0xa7   :  { %v486_v15 = vpop.f32.mrf.mxu0  ;;  %v142_v22 = vpop.f32.mrf.mxu1 }
  0xa8   :  { %173 = vst [vmem:[%s544_s4 + $0x8] sm:$0xff] %v486_v15  ;;  %v151_v23 = vpop.f32.mrf.mxu2  ;;  %v215_v43 = vmul.f32 %v142_v22, %v142_v22  ;;  %v210_v48 = vmul.f32 %v486_v15, %v486_v15 }
  0xa9   :  { %178 = vst [vmem:[%s544_s4 + $0x30] sm:$0xff] %v142_v22  ;;  %v218_v40 = vmul.f32 %v151_v23, %v151_v23 }
  0xaa   :  { %181 = vst [vmem:[%s544_s4 + $0x48] sm:$0xff] %v151_v23 }
  0xac   :  { %v160_v24 = vpop.f32.mrf.mxu3 }
  0xad   :  { %184 = vst [vmem:[%s544_s4 + $0x60] sm:$0xff] %v160_v24  ;;  %v221_v37 = vmul.f32 %v160_v24, %v160_v24 }
  0xaf   :  { %v130_v25 = vpop.f32.mrf.mxu0  ;;  %v145_v26 = vpop.f32.mrf.mxu1 }
  0xb0   :  { %174 = vst [vmem:[%s544_s4 + $0x10] sm:$0xff] %v130_v25  ;;  %v154_v27 = vpop.f32.mrf.mxu2  ;;  %v216_v42 = vmul.f32 %v145_v26, %v145_v26  ;;  %v211_v47 = vmul.f32 %v130_v25, %v130_v25 }
  0xb1   :  { %179 = vst [vmem:[%s544_s4 + $0x38] sm:$0xff] %v145_v26  ;;  %v219_v39 = vmul.f32 %v154_v27, %v154_v27 }
  0xb2   :  { %182 = vst [vmem:[%s544_s4 + $0x50] sm:$0xff] %v154_v27 }
  0xb4   :  { %v163_v28 = vpop.f32.mrf.mxu3 }
  0xb5   :  { %185 = vst [vmem:[%s544_s4 + $0x68] sm:$0xff] %v163_v28  ;;  %v222_v36 = vmul.f32 %v163_v28, %v163_v28 }
  0xb7   :  { %v133_v29 = vpop.f32.mrf.mxu0  ;;  %v148_v30 = vpop.f32.mrf.mxu1 }
  0xb8   :  { %175 = vst [vmem:[%s544_s4 + $0x18] sm:$0xff] %v133_v29  ;;  %v217_v41 = vmul.f32 %v148_v30, %v148_v30  ;;  %v212_v46 = vmul.f32 %v133_v29, %v133_v29 }
  0xb9   :  { %180 = vst [vmem:[%s544_s4 + $0x40] sm:$0xff] %v148_v30 }
  0xbc   :  { %v166_v31 = vpop.f32.mrf.mxu3 }
  0xbd   :  { %186 = vst [vmem:[%s544_s4 + $0x70] sm:$0xff] %v166_v31  ;;  %v223_v35 = vmul.f32 %v166_v31, %v166_v31 }
  0xbf   :  { %v136_v32 = vpop.f32.mrf.mxu0 }
  0xc0   :  { %176 = vst [vmem:[%s544_s4 + $0x20] sm:$0xff] %v136_v32  ;;  %v213_v45 = vmul.f32 %v136_v32, %v136_v32 }
  0xc4   :  { %v169_v33 = vpop.f32.mrf.mxu3 }
  0xc5   :  { %187 = vst [vmem:[%s544_s4 + $0x78] sm:$0xff] %v169_v33  ;;  %188 = vmatpush.msrb.mxu1 %v169_v33  ;;  %v224_v34 = vmul.f32 %v169_v33, %v169_v33 }
  0xc7   :  { %189 = vmatpush.msrb.mxu1 %v166_v31  ;;  %225 = vmatpush.msrb.mxu2 %v224_v34 }
  0xc9   :  { %190 = vmatpush.msrb.mxu1 %v163_v28  ;;  %226 = vmatpush.msrb.mxu2 %v223_v35 }
  0xcb   :  { %191 = vmatpush.msrb.mxu1 %v160_v24  ;;  %227 = vmatpush.msrb.mxu2 %v222_v36 }
  0xcd   :  { %192 = vmatpush.msrb.mxu1 %v157_v10  ;;  %228 = vmatpush.msrb.mxu2 %v221_v37 }
  0xcf   :  { %193 = vmatpush.msrb.mxu1 %v154_v27  ;;  %229 = vmatpush.msrb.mxu2 %v220_v38 }
  0xd1   :  { %194 = vmatpush.msrb.mxu1 %v151_v23  ;;  %230 = vmatpush.msrb.mxu2 %v219_v39 }
  0xd3   :  { %195 = vmatpush.msrb.mxu1 %v148_v30  ;;  %231 = vmatpush.msrb.mxu2 %v218_v40 }
  0xd5   :  { %196 = vmatpush.msrb.mxu1 %v145_v26  ;;  %232 = vmatpush.msrb.mxu2 %v217_v41 }
  0xd7   :  { %197 = vmatpush.msrb.mxu1 %v142_v22  ;;  %233 = vmatpush.msrb.mxu2 %v216_v42 }
  0xd9   :  { %198 = vmatpush.msrb.mxu1 %v139_v21  ;;  %234 = vmatpush.msrb.mxu2 %v215_v43 }
  0xdb   :  { %199 = vmatpush.msrb.mxu1 %v136_v32  ;;  %235 = vmatpush.msrb.mxu2 %v214_v44 }
  0xdd   :  { %200 = vmatpush.msrb.mxu1 %v133_v29  ;;  %236 = vmatpush.msrb.mxu2 %v213_v45 }
  0xdf   :  { %201 = vmatpush.msrb.mxu1 %v130_v25  ;;  %237 = vmatpush.msrb.mxu2 %v212_v46 }
  0xe1   :  { %202 = vmatpush.msrb.mxu1 %v486_v15  ;;  %238 = vmatpush.msrb.mxu2 %v211_v47 }
  0xe3   :  { %203 = vmatpush.msrb.mxu1 %v474_v20  ;;  %239 = vmatpush.msrb.mxu2 %v210_v48 }
  0xe4   :  { %204 = vmatmul.f32.vlgmr.msrb.gmra.mxu1 %v305_v50 }
  0xe5   :  { %240 = vmatpush.msrb.mxu2 %v209_v49 }
  0xe6   :  { %241 = vmatmul.f32.vlgmr.msrb.gmra.mxu2 %v305_v50 }
 0x161   :  { %v205_v51 = vpop.f32.mrf.mxu1 }
 0x162   :  { %208 = vst [vmem:[%s545_s5] sm:$0x1] %v205_v51 }
 0x169   :  { %v242_v52 = vpop.f32.mrf.mxu2 }
 0x16a   :  { %245 = vst [vmem:[%s545_s5 + $0x1] sm:$0x1] %v242_v52 }

// kernel: mlp_bn_side_projection.9
= control target key start
LH: loop header
LB: loop body
LE: loop exit
PB: predicated region body
PF: predicated region fallthrough
CT: control target
= control target key end

     0   :  { %s469_s0 = inlined_call_operand.vmem [shape: f32[128,128], index: 0, kind: input, shape index: {}]   ;;  %s470_s1 = inlined_call_operand.vmem [shape: f32[1,128], index: 1, kind: input, shape index: {}]   ;;  %s471_s2 = inlined_call_operand.vmem [shape: f32[1,128], index: 2, kind: input, shape index: {}]   ;;  %s472_s3 = inlined_call_operand.vmem [shape: f32[128,128], index: 3, kind: input, shape index: {}]   ;;  %s473_s4 = inlined_call_operand.vmem [shape: f32[1,128], index: 4, kind: input, shape index: {}]   ;;  %s474_s5 = inlined_call_operand.hbm [shape: f32[128,128], index: 5, kind: output, shape index: {}]  }
   0x1   :  { %v108_v0 = vld [vmem:[%s472_s3 + $0x78] sm:$0xff]  ;;  %v107_v1 = vld [vmem:[%s472_s3 + $0x70] sm:$0xff]  ;;  %v106_v2 = vld [vmem:[%s472_s3 + $0x68] sm:$0xff] }
   0x2   :  { %213 = vmatpush.msra.mxu2 %v108_v0  ;;  %214 = vmatpush.msra.mxu3 %v108_v0  ;;  %v105_v3 = vld [vmem:[%s472_s3 + $0x60] sm:$0xff]  ;;  %v104_v4 = vld [vmem:[%s472_s3 + $0x58] sm:$0xff]  ;;  %v103_v5 = vld [vmem:[%s472_s3 + $0x50] sm:$0xff] }
   0x3   :  { %113 = vmatpush.msra.mxu0 %v108_v0  ;;  %212 = vmatpush.msra.mxu1 %v108_v0  ;;  %v102_v6 = vld [vmem:[%s472_s3 + $0x48] sm:$0xff] }
   0x4   :  { %216 = vmatpush.msra.mxu2 %v107_v1  ;;  %217 = vmatpush.msra.mxu3 %v107_v1 }
   0x5   :  { %114 = vmatpush.msra.mxu0 %v107_v1  ;;  %215 = vmatpush.msra.mxu1 %v107_v1 }
   0x6   :  { %219 = vmatpush.msra.mxu2 %v106_v2  ;;  %220 = vmatpush.msra.mxu3 %v106_v2 }
   0x7   :  { %115 = vmatpush.msra.mxu0 %v106_v2  ;;  %218 = vmatpush.msra.mxu1 %v106_v2 }
   0x8   :  { %222 = vmatpush.msra.mxu2 %v105_v3  ;;  %223 = vmatpush.msra.mxu3 %v105_v3 }
   0x9   :  { %116 = vmatpush.msra.mxu0 %v105_v3  ;;  %221 = vmatpush.msra.mxu1 %v105_v3 }
   0xa   :  { %225 = vmatpush.msra.mxu2 %v104_v4  ;;  %226 = vmatpush.msra.mxu3 %v104_v4 }
   0xb   :  { %117 = vmatpush.msra.mxu0 %v104_v4  ;;  %224 = vmatpush.msra.mxu1 %v104_v4 }
   0xc   :  { %10 = vsyncpa [#allocation3], 0  ;;  %228 = vmatpush.msra.mxu2 %v103_v5  ;;  %229 = vmatpush.msra.mxu3 %v103_v5  ;;  %v101_v7 = vld [vmem:[%s472_s3 + $0x40] sm:$0xff]  ;;  %v100_v8 = vld [vmem:[%s472_s3 + $0x38] sm:$0xff]  ;;  %s200_s10 = sshll.u32 %s474_s5, 4  ;;  %s293_s11 = smov 128   ;;  %s201_s10 = int_to_ptr.hbm [resolvable:$true] %s200_s10 }
   0xd   :  { %118 = vmatpush.msra.mxu0 %v103_v5  ;;  %227 = vmatpush.msra.mxu1 %v103_v5  ;;  %v99_v9 = vld [vmem:[%s472_s3 + $0x30] sm:$0xff]  ;;  %v358_v10 = vld [vmem:[%s470_s1] ss:$0 sm:$0xff]  ;;  %v98_v13 = vld [vmem:[%s472_s3 + $0x28] sm:$0xff]  ;;  %s294_s12 = smov 8  }
   0xe   :  { %231 = vmatpush.msra.mxu2 %v102_v6  ;;  %232 = vmatpush.msra.mxu3 %v102_v6  ;;  %v29_v11 = vld [vmem:[%s469_s0 + $0x40] sm:$0xff]  ;;  %v96_v20 = vld [vmem:[%s472_s3 + $0x18] sm:$0xff]  ;;  %v95_v23 = vld [vmem:[%s472_s3 + $0x10] sm:$0xff] }
   0xf   :  { %119 = vmatpush.msra.mxu0 %v102_v6  ;;  %230 = vmatpush.msra.mxu1 %v102_v6  ;;  %v33_v12 = vld [vmem:[%s469_s0 + $0x60] sm:$0xff]  ;;  %v49_v17 = vmul.f32 %v358_v10, %v29_v11  ;;  %v30_v26 = vld [vmem:[%s469_s0 + $0x48] sm:$0xff]  ;;  %v31_v44 = vld [vmem:[%s469_s0 + $0x50] sm:$0xff] }
  0x10   :  { %234 = vmatpush.msra.mxu2 %v101_v7  ;;  %235 = vmatpush.msra.mxu3 %v101_v7  ;;  %v21_v14 = vld [vmem:[%s469_s0] sm:$0xff]  ;;  %v53_v19 = vmul.f32 %v358_v10, %v33_v12  ;;  %v34_v27 = vld [vmem:[%s469_s0 + $0x68] sm:$0xff]  ;;  %v50_v36 = vmul.f32 %v358_v10, %v30_v26  ;;  %v35_v45 = vld [vmem:[%s469_s0 + $0x70] sm:$0xff]  ;;  %v51_v52 = vmul.f32 %v358_v10, %v31_v44 }
  0x11   :  { %120 = vmatpush.msra.mxu0 %v101_v7  ;;  %233 = vmatpush.msra.mxu1 %v101_v7  ;;  %v25_v15 = vld [vmem:[%s469_s0 + $0x20] sm:$0xff]  ;;  %v41_v21 = vmul.f32 %v358_v10, %v21_v14  ;;  %v94_v28 = vld [vmem:[%s472_s3 + $0x8] sm:$0xff]  ;;  %v54_v37 = vmul.f32 %v358_v10, %v34_v27  ;;  %v23_v48 = vld [vmem:[%s469_s0 + $0x10] sm:$0xff]  ;;  %v55_v53 = vmul.f32 %v358_v10, %v35_v45 }
  0x12   :  { %237 = vmatpush.msra.mxu2 %v100_v8  ;;  %238 = vmatpush.msra.mxu3 %v100_v8  ;;  %v97_v16 = vld [vmem:[%s472_s3 + $0x20] sm:$0xff]  ;;  %v45_v22 = vmul.f32 %v358_v10, %v25_v15  ;;  %v22_v31 = vld [vmem:[%s469_s0 + $0x8] sm:$0xff]  ;;  %v27_v49 = vld [vmem:[%s469_s0 + $0x30] sm:$0xff]  ;;  %v43_v56 = vmul.f32 %v358_v10, %v23_v48 }
  0x13   :  { %121 = vmatpush.msra.mxu0 %v100_v8  ;;  %236 = vmatpush.msra.mxu1 %v100_v8  ;;  %v382_v18 = vld [vmem:[%s471_s2] ss:$0 sm:$0xff]  ;;  %v26_v32 = vld [vmem:[%s469_s0 + $0x28] sm:$0xff]  ;;  %v42_v40 = vmul.f32 %v358_v10, %v22_v31  ;;  %v47_v57 = vmul.f32 %v358_v10, %v27_v49  ;;  %v32_v60 = vld [vmem:[%s469_s0 + $0x58] sm:$0xff] }
  0x14   :  { %240 = vmatpush.msra.mxu2 %v99_v9  ;;  %241 = vmatpush.msra.mxu3 %v99_v9  ;;  %v69_v24 = vadd.f32 %v382_v18, %v49_v17  ;;  %v73_v25 = vadd.f32 %v382_v18, %v53_v19  ;;  %v61_v29 = vadd.f32 %v382_v18, %v41_v21  ;;  %v93_v33 = vld [vmem:[%s472_s3] sm:$0xff]  ;;  %v36_v61 = vld [vmem:[%s469_s0 + $0x78] sm:$0xff] }
  0x15   :  { %122 = vmatpush.msra.mxu0 %v99_v9  ;;  %239 = vmatpush.msra.mxu1 %v99_v9  ;;  %v65_v30 = vadd.f32 %v382_v18, %v45_v22  ;;  %v46_v41 = vmul.f32 %v358_v10, %v26_v32  ;;  %v70_v42 = vadd.f32 %v382_v18, %v50_v36  ;;  %v24_v0 = vld [vmem:[%s469_s0 + $0x18] sm:$0xff] }
  0x16   :  { %243 = vmatpush.msra.mxu2 %v98_v13  ;;  %244 = vmatpush.msra.mxu3 %v98_v13  ;;  %v85_v34 = vmax.f32 %v69_v24, 0.0  ;;  %v89_v35 = vmax.f32 %v73_v25, 0.0  ;;  %v77_v38 = vmax.f32 %v61_v29, 0.0  ;;  %v74_v43 = vadd.f32 %v382_v18, %v54_v37  ;;  %v28_v1 = vld [vmem:[%s469_s0 + $0x38] sm:$0xff] }
  0x17   :  { %123 = vmatpush.msra.mxu0 %v98_v13  ;;  %242 = vmatpush.msra.mxu1 %v98_v13  ;;  %v81_v39 = vmax.f32 %v65_v30, 0.0  ;;  %v62_v46 = vadd.f32 %v382_v18, %v42_v40  ;;  %v66_v47 = vadd.f32 %v382_v18, %v46_v41  ;;  %v86_v50 = vmax.f32 %v70_v42, 0.0 }
  0x18   :  { %246 = vmatpush.msra.mxu2 %v97_v16  ;;  %247 = vmatpush.msra.mxu3 %v97_v16  ;;  %v90_v51 = vmax.f32 %v74_v43, 0.0  ;;  %v71_v58 = vadd.f32 %v382_v18, %v51_v52  ;;  %v75_v59 = vadd.f32 %v382_v18, %v55_v53  ;;  %v63_v62 = vadd.f32 %v382_v18, %v43_v56 }
  0x19   :  { %124 = vmatpush.msra.mxu0 %v97_v16  ;;  %245 = vmatpush.msra.mxu1 %v97_v16  ;;  %v78_v54 = vmax.f32 %v62_v46, 0.0  ;;  %v82_v55 = vmax.f32 %v66_v47, 0.0  ;;  %v67_v63 = vadd.f32 %v382_v18, %v47_v57  ;;  %v52_v4 = vmul.f32 %v358_v10, %v32_v60 }
  0x1a   :  { %249 = vmatpush.msra.mxu2 %v96_v20  ;;  %250 = vmatpush.msra.mxu3 %v96_v20  ;;  %v87_v2 = vmax.f32 %v71_v58, 0.0  ;;  %v91_v3 = vmax.f32 %v75_v59, 0.0  ;;  %v56_v5 = vmul.f32 %v358_v10, %v36_v61  ;;  %v79_v6 = vmax.f32 %v63_v62, 0.0 }
  0x1b   :  { %125 = vmatpush.msra.mxu0 %v96_v20  ;;  %248 = vmatpush.msra.mxu1 %v96_v20  ;;  %v83_v7 = vmax.f32 %v67_v63, 0.0  ;;  %v44_v8 = vmul.f32 %v358_v10, %v24_v0  ;;  %v48_v9 = vmul.f32 %v358_v10, %v28_v1  ;;  %v72_v11 = vadd.f32 %v382_v18, %v52_v4  ;;  %v265_v10 = vld [vmem:[%s473_s4] ss:$0 sm:$0xff]  ;;  %s292_s4 = smov [#allocation2]  }
  0x1c   :  { %252 = vmatpush.msra.mxu2 %v95_v23  ;;  %253 = vmatpush.msra.mxu3 %v95_v23  ;;  %v76_v12 = vadd.f32 %v382_v18, %v56_v5  ;;  %s198_s7 = sshll.u32 %s292_s4, 4  ;;  %s199_s7 = int_to_ptr.vmem [resolvable:$true] %s198_s7 }
  0x1d   :  { %126 = vmatpush.msra.mxu0 %v95_v23  ;;  %251 = vmatpush.msra.mxu1 %v95_v23  ;;  %v64_v13 = vadd.f32 %v382_v18, %v44_v8  ;;  %v68_v14 = vadd.f32 %v382_v18, %v48_v9  ;;  %v88_v15 = vmax.f32 %v72_v11, 0.0 }
  0x1e   :  { %255 = vmatpush.msra.mxu2 %v94_v28  ;;  %256 = vmatpush.msra.mxu3 %v94_v28  ;;  %v92_v16 = vmax.f32 %v76_v12, 0.0 }
  0x1f   :  { %127 = vmatpush.msra.mxu0 %v94_v28  ;;  %254 = vmatpush.msra.mxu1 %v94_v28  ;;  %v80_v17 = vmax.f32 %v64_v13, 0.0  ;;  %v84_v19 = vmax.f32 %v68_v14, 0.0 }
  0x20   :  { %258 = vmatpush.msra.mxu2 %v93_v33  ;;  %259 = vmatpush.msra.mxu3 %v93_v33 }
  0x21   :  { %153 = vmatmul.f32.vlgmr.msra.gmra.mxu2 %v85_v34  ;;  %165 = vmatmul.f32.vlgmr.msra.gmra.mxu3 %v89_v35 }
  0x22   :  { %128 = vmatpush.msra.mxu0 %v93_v33  ;;  %257 = vmatpush.msra.mxu1 %v93_v33 }
  0x23   :  { %129 = vmatmul.f32.vlgmr.msra.gmra.mxu0 %v77_v38  ;;  %141 = vmatmul.f32.vlgmr.msra.gmra.mxu1 %v81_v39 }
  0x29   :  { %156 = vmatmul.f32.gmra.mxu2 %v86_v50  ;;  %168 = vmatmul.f32.gmra.mxu3 %v90_v51 }
  0x2b   :  { %132 = vmatmul.f32.gmra.mxu0 %v78_v54  ;;  %144 = vmatmul.f32.gmra.mxu1 %v82_v55 }
  0x31   :  { %159 = vmatmul.f32.gmra.mxu2 %v87_v2  ;;  %171 = vmatmul.f32.gmra.mxu3 %v91_v3 }
  0x33   :  { %135 = vmatmul.f32.gmra.mxu0 %v79_v6  ;;  %147 = vmatmul.f32.gmra.mxu1 %v83_v7 }
  0x39   :  { %162 = vmatmul.f32.gmra.mxu2 %v88_v15  ;;  %174 = vmatmul.f32.gmra.mxu3 %v92_v16 }
  0x3b   :  { %138 = vmatmul.f32.gmra.mxu0 %v80_v17  ;;  %150 = vmatmul.f32.gmra.mxu1 %v84_v19 }
  0xa0   :  { %v130_v20 = vpop.f32.mrf.mxu0  ;;  %v142_v21 = vpop.f32.mrf.mxu1 }
  0xa1   :  { %v131_v22 = vadd.f32 %v265_v10, %v130_v20  ;;  %v143_v23 = vadd.f32 %v265_v10, %v142_v21 }
  0xa3   :  { %178 = vst [vmem:[#allocation2] sm:$0xff] %v131_v22 }
  0xa4   :  { %182 = vst [vmem:[#allocation2 + $0x20] sm:$0xff] %v143_v23  ;;  %v154_v24 = vpop.f32.mrf.mxu2  ;;  %v166_v18 = vpop.f32.mrf.mxu3 }
  0xa5   :  { %v155_v25 = vadd.f32 %v265_v10, %v154_v24  ;;  %v167_v26 = vadd.f32 %v265_v10, %v166_v18 }
  0xa7   :  { %186 = vst [vmem:[#allocation2 + $0x40] sm:$0xff] %v155_v25 }
  0xa8   :  { %190 = vst [vmem:[#allocation2 + $0x60] sm:$0xff] %v167_v26  ;;  %v133_v27 = vpop.f32.mrf.mxu0  ;;  %v145_v28 = vpop.f32.mrf.mxu1 }
  0xa9   :  { %v134_v29 = vadd.f32 %v265_v10, %v133_v27  ;;  %v146_v30 = vadd.f32 %v265_v10, %v145_v28 }
  0xab   :  { %179 = vst [vmem:[#allocation2 + $0x8] sm:$0xff] %v134_v29 }
  0xac   :  { %183 = vst [vmem:[#allocation2 + $0x28] sm:$0xff] %v146_v30  ;;  %v157_v31 = vpop.f32.mrf.mxu2  ;;  %v169_v32 = vpop.f32.mrf.mxu3 }
  0xad   :  { %v158_v33 = vadd.f32 %v265_v10, %v157_v31  ;;  %v170_v34 = vadd.f32 %v265_v10, %v169_v32 }
  0xaf   :  { %187 = vst [vmem:[#allocation2 + $0x48] sm:$0xff] %v158_v33 }
  0xb0   :  { %191 = vst [vmem:[#allocation2 + $0x68] sm:$0xff] %v170_v34  ;;  %v136_v35 = vpop.f32.mrf.mxu0  ;;  %v148_v36 = vpop.f32.mrf.mxu1 }
  0xb1   :  { %v137_v37 = vadd.f32 %v265_v10, %v136_v35  ;;  %v149_v38 = vadd.f32 %v265_v10, %v148_v36 }
  0xb3   :  { %180 = vst [vmem:[#allocation2 + $0x10] sm:$0xff] %v137_v37 }
  0xb4   :  { %184 = vst [vmem:[#allocation2 + $0x30] sm:$0xff] %v149_v38  ;;  %v160_v39 = vpop.f32.mrf.mxu2  ;;  %v172_v40 = vpop.f32.mrf.mxu3 }
  0xb5   :  { %v161_v41 = vadd.f32 %v265_v10, %v160_v39  ;;  %v173_v42 = vadd.f32 %v265_v10, %v172_v40 }
  0xb7   :  { %188 = vst [vmem:[#allocation2 + $0x50] sm:$0xff] %v161_v41 }
  0xb8   :  { %192 = vst [vmem:[#allocation2 + $0x70] sm:$0xff] %v173_v42  ;;  %v139_v43 = vpop.f32.mrf.mxu0  ;;  %v151_v44 = vpop.f32.mrf.mxu1 }
  0xb9   :  { %v140_v45 = vadd.f32 %v265_v10, %v139_v43  ;;  %v152_v46 = vadd.f32 %v265_v10, %v151_v44 }
  0xbb   :  { %181 = vst [vmem:[#allocation2 + $0x18] sm:$0xff] %v140_v45 }
  0xbc   :  { %185 = vst [vmem:[#allocation2 + $0x38] sm:$0xff] %v152_v46  ;;  %v163_v47 = vpop.f32.mrf.mxu2  ;;  %v175_v48 = vpop.f32.mrf.mxu3 }
  0xbd   :  { %v164_v49 = vadd.f32 %v265_v10, %v163_v47  ;;  %v176_v50 = vadd.f32 %v265_v10, %v175_v48 }
  0xbf   :  { %189 = vst [vmem:[#allocation2 + $0x58] sm:$0xff] %v164_v49 }
  0xc0   :  { %193 = vst [vmem:[#allocation2 + $0x78] sm:$0xff] %v176_v50 }
  0xc1   :  { %206 = dma.vmem_to_hbm [thread:$0]  %s199_s7, 2048, %s201_s10, [#allocation3], %s293_s11, %s293_s11, %s294_s12  }
  0xc2   :  { %290 = dma.done.wait [#allocation3], 2048  }
  0xc3   :  { %291 = vsyncadd [#allocation3], 4294965248 }
  0xc4   :  { %211 = vsyncpa [#allocation3], 1 }

</bundles_post_ra>
